<compile_context>
chip_gen: v7x
topology: tpu7x:2x2x1
jax: 0.10.0
libtpu: 0.0.40
codegen_flags: <defaults>
</compile_context>

<pallas_src>
import functools
import math

import jax
import jax.numpy as jnp
from jax import lax
from jax.experimental import pallas as pl
from jax.experimental.pallas import tpu as pltpu

_EPS = 1e-8


# ---------------------------------------------------------------------------
# Prologue: normalize each row once, emit xn + per-row scalar stats.
# ---------------------------------------------------------------------------
def _normalize_kernel(x_ref, xn_ref, sr_ref, sc_ref):
    eps = jnp.float32(_EPS)
    x = x_ref[...].astype(jnp.float32)                       # (T, D)
    sq = jnp.sum(x * x, axis=-1, keepdims=True)              # (T, 1)
    den = jnp.maximum(jnp.sqrt(sq), eps)                     # clamp_min(||x||, eps)
    xn_ref[...] = (x / den).astype(xn_ref.dtype)
    s = jnp.sum(x, axis=-1, keepdims=True) / den             # sum(xn)
    nsq = sq / (den * den)                                    # ||xn||^2
    sr_ref[...] = nsq + 2.0 * eps * s                        # query-side stat
    sc_ref[...] = nsq - 2.0 * eps * s                        # candidate-side stat


# ---------------------------------------------------------------------------
# Main streaming nearest-neighbor kernel.
# ---------------------------------------------------------------------------
def _koleo_nn_kernel(b_valid, d_model, mask_cols, xr_ref, xc_ref, sr_ref,
                     sc_ref, o_ref, m_ref, c_ref):
    eps = jnp.float32(_EPS)
    i = pl.program_id(0)
    j = pl.program_id(1)
    n_col = pl.num_programs(1)
    TR = xr_ref.shape[0]
    TC = xc_ref.shape[0]

    @pl.when(j == 0)
    def _init():
        m_ref[...] = jnp.full(m_ref.shape, -jnp.inf, jnp.float32)
        c_ref[...] = jnp.zeros(c_ref.shape, jnp.float32)

    # Pairwise dots of pre-normalized rows; contract the last dims directly
    # (no materialized transpose).  bf16 xn hits the fast MXU path.
    dots = lax.dot_general(xr_ref[...], xc_ref[...],
                           (((1,), (1,)), ((), ())),
                           preferred_element_type=jnp.float32)        # (TR, TC)

    # Kill the global diagonal (dots[i,i] := -1, as in the PyTorch module) and
    # (statically, only when the batch was padded) the padded candidate cols.
    col_ids = lax.broadcasted_iota(jnp.int32, (TR, TC), 1)
    col_global = col_ids + j * TC
    row_global = lax.broadcasted_iota(jnp.int32, (TR, 1), 0) + i * TR
    dots = jnp.where(col_global == row_global, jnp.float32(-1.0), dots)
    if mask_cols:
        dots = jnp.where(col_global >= b_valid, jnp.float32(-2.0), dots)

    # Within-tile max + first-index argmax (torch.max tie-break).
    tile_max = jnp.max(dots, axis=1, keepdims=True)                   # (TR, 1)
    first = jnp.min(jnp.where(dots == tile_max, col_ids, TC),
                    axis=1, keepdims=True)                            # (TR, 1)
    onehot = (col_ids == first).astype(jnp.float32)                   # (TR, TC)

    # Single tiny matvec gathers the winner's merged candidate stat
    # (||xn_I||^2 - 2*eps*sum(xn_I)): O(TR*TC), not O(TR*TC*D).
    c_sel = lax.dot_general(onehot, sc_ref[...],
                            (((1,), (0,)), ((), ())),
                            preferred_element_type=jnp.float32)       # (TR, 1)

    # Running carry: strict '>' keeps the earliest (global first-index) winner.
    m_prev = m_ref[...]
    upd = tile_max > m_prev
    m_ref[...] = jnp.where(upd, tile_max, m_prev)
    c_ref[...] = jnp.where(upd, c_sel, c_ref[...])

    @pl.when(j == n_col - 1)
    def _finalize():
        # ||xn_i - xn_I + eps||^2 expanded from O(1) scalars.  NOTE: for
        # near-duplicate neighbors (dot -> 1) this expansion loses precision
        # vs torch's direct elementwise difference (catastrophic cancellation);
        # the clamp guards tiny negative rounding.
        # TODO(synk): if the argmax lands on the masked diagonal itself (only
        # possible for B == 1 / pathological inputs), torch would use the true
        # self-distance; this expansion uses the masked -1 value instead.
        d2 = (sr_ref[...] + c_ref[...] - 2.0 * m_ref[...]
              + jnp.float32(d_model) * eps * eps)
        dist = jnp.sqrt(jnp.maximum(d2, 0.0))
        o_ref[...] = jnp.log(dist + eps)


# ---------------------------------------------------------------------------
# Tiling heuristics.
# ---------------------------------------------------------------------------
def _round_up(n, m):
    return -(-n // m) * m


def _pick_tiles(b, d, bytes_el):
    """Pick (TR, TC, B_padded): decoupled query / candidate tiles."""
    budget = 36 * 1024 * 1024  # fits v7x's 64 MiB/core scoped VMEM with headroom

    def fits(tr, tc):
        # double-buffered row + col xn tiles, (TR,TC) f32 temporaries, carries.
        need = (2 * tr * d * bytes_el + 2 * tc * d * bytes_el
                + 4 * tr * tc * 4 + 8 * (tr + tc) * 4)
        return need <= budget

    b8 = _round_up(max(b, 1), 8)

    # Small batch: a single tile each way.
    if b8 <= 256 and fits(b8, b8):
        return b8, b8, b8

    # General case: candidate tile fixed at an MXU-friendly 256; query tile as
    # large as the VMEM budget allows (the candidate HBM stream is B^2*D/TR).
    tc = 256
    tr = 0
    for cand in (2048, 1024, 512, 256):
        if fits(cand, tc):
            tr = cand
            break
    if tr:
        tr = min(tr, _round_up(b8, 256))
        # v7x megacore: prefer >= 2 query tiles for large batches so both
        # TensorCores get work on the "parallel" axis.
        if tr >= b8 and b8 > 512:
            tr = max(256, _round_up(b8 // 2, 256))
        return tr, tc, _round_up(b, tr)

    # Huge-D fallback: shrink both tiles together.
    for t in (128, 64, 32, 16, 8):
        if fits(t, t):
            return t, t, _round_up(b, t)
    return 8, 8, _round_up(b, 8)


def _prologue_tile(tr, d, xn_bytes):
    """Row tile for the normalization prologue (must divide tr)."""
    budget = 24 * 1024 * 1024

    def fits(t):
        return 2 * t * d * (4 + xn_bytes) + 64 * t <= budget

    if fits(tr):
        return tr
    t = tr
    while t > 8:
        t //= 2
        if t % 8 == 0 and tr % t == 0 and fits(t):
            return t
    return 8


# ---------------------------------------------------------------------------
# Public wrapper.
# ---------------------------------------------------------------------------
def koleo_loss_proportions(x, *, use_bf16_matmul=False, tiles=None):
    """x: (B, D) array. Returns scalar f32 loss (KoLeoLossProportions.forward).

    use_bf16_matmul=True stores the normalized rows in bf16 (halves the
    candidate HBM stream and uses the fast bf16 MXU path on v6e/v7x) at the
    cost of slight drift in NN selection vs the f32 reference.
    `tiles=(TR, TC)` overrides the tile heuristic (testing / tuning only).
    """
    x = jnp.asarray(x)
    B, D = x.shape
    xn_dtype = jnp.bfloat16 if use_bf16_matmul else jnp.float32
    xn_bytes = 2 if use_bf16_matmul else 4

    if tiles is None:
        TR, TC, Bp = _pick_tiles(B, D, xn_bytes)
    else:
        TR, TC = tiles
        assert TR % 8 == 0 and TC % 8 == 0, "tiles must be multiples of 8"
        Bp = _round_up(B, math.lcm(TR, TC))

    if Bp != B:
        x = jnp.pad(x, ((0, Bp - B), (0, 0)))

    n_row = Bp // TR
    n_col = Bp // TC
    vmem_limit = 48 * 1024 * 1024

    # --- prologue: normalize once, emit xn + merged per-row stats ----------
    TP = _prologue_tile(TR, D, xn_bytes)
    xn, stat_r, stat_c = pl.pallas_call(
        _normalize_kernel,
        out_shape=(
            jax.ShapeDtypeStruct((Bp, D), xn_dtype),
            jax.ShapeDtypeStruct((Bp, 1), jnp.float32),
            jax.ShapeDtypeStruct((Bp, 1), jnp.float32),
        ),
        grid_spec=pltpu.PrefetchScalarGridSpec(
            num_scalar_prefetch=0,
            grid=(Bp // TP,),
            in_specs=[pl.BlockSpec((TP, D), lambda i: (i, 0))],
            out_specs=(
                pl.BlockSpec((TP, D), lambda i: (i, 0)),
                pl.BlockSpec((TP, 1), lambda i: (i, 0)),
                pl.BlockSpec((TP, 1), lambda i: (i, 0)),
            ),
        ),
        compiler_params=pltpu.CompilerParams(
            dimension_semantics=("parallel",),
            vmem_limit_bytes=vmem_limit,
        ),
    )(x)

    # --- main streaming NN search ------------------------------------------
    kernel = functools.partial(_koleo_nn_kernel, B, D, Bp > B)
    per_row = pl.pallas_call(
        kernel,
        out_shape=jax.ShapeDtypeStruct((Bp, 1), jnp.float32),
        grid_spec=pltpu.PrefetchScalarGridSpec(
            num_scalar_prefetch=0,
            grid=(n_row, n_col),
            in_specs=[
                pl.BlockSpec((TR, D), lambda i, j: (i, 0)),   # query rows (xn)
                pl.BlockSpec((TC, D), lambda i, j: (j, 0)),   # candidate rows (xn)
                pl.BlockSpec((TR, 1), lambda i, j: (i, 0)),   # query stat
                pl.BlockSpec((TC, 1), lambda i, j: (j, 0)),   # candidate stat
            ],
            out_specs=pl.BlockSpec((TR, 1), lambda i, j: (i, 0)),
            scratch_shapes=[pltpu.VMEM((TR, 1), jnp.float32)] * 2,
        ),
        compiler_params=pltpu.CompilerParams(
            dimension_semantics=("parallel", "arbitrary"),
            vmem_limit_bytes=vmem_limit,
        ),
        cost_estimate=pl.CostEstimate(
            flops=2 * Bp * Bp * D + 2 * Bp * Bp,
            transcendentals=2 * Bp,
            # candidate stream re-read per row tile; row stream read once.
            bytes_accessed=(xn_bytes * (n_row * Bp * D + Bp * D)
                            + 4 * (n_row * Bp + Bp) + 4 * Bp),
        ),
    )(xn, xn, stat_r, stat_c)

    # Final scalar: -mean over the valid rows (tiny jnp reduce; no 2nd kernel).
    return -jnp.mean(per_row[:B, 0])


# ---------------------------------------------------------------------------
# Pure-JAX reference mirroring the PyTorch module (for validation).
# ---------------------------------------------------------------------------
def _reference(x, eps=1e-8):
    x = x.astype(jnp.float32)
    norm = jnp.linalg.norm(x, axis=-1, keepdims=True)
    xn = x / jnp.maximum(norm, eps)
    dots = jnp.matmul(xn, xn.T, precision=lax.Precision.HIGHEST)
    n = x.shape[0]
    dots = dots.at[jnp.arange(n), jnp.arange(n)].set(-1.0)
    nn_idx = jnp.argmax(dots, axis=1)
    diff = xn - xn[nn_idx] + eps
    dist = jnp.sqrt(jnp.sum(diff * diff, axis=-1))
    return -jnp.mean(jnp.log(dist + eps))


if __name__ == "__main__":
    # Small single-tile case.
    x = jax.random.normal(jax.random.PRNGKey(0), (8, 32), dtype=jnp.float32)
    loss = koleo_loss_proportions(x)
    jax.block_until_ready(loss)
    ref = _reference(x)
    assert jnp.allclose(loss, ref, atol=1e-4, rtol=1e-4), (loss, ref)

    # Multi-tile path (3x3 grid of 8-row tiles) exercising the streaming carry
    # and cross-tile first-index tie-break.
    x2 = jax.random.normal(jax.random.PRNGKey(1), (24, 32), dtype=jnp.float32)
    loss2 = koleo_loss_proportions(x2, tiles=(8, 8))
    jax.block_until_ready(loss2)
    ref2 = _reference(x2)
    assert jnp.allclose(loss2, ref2, atol=1e-4, rtol=1e-4), (loss2, ref2)

    # Padded batch + decoupled TR/TC (B=20 -> padded to 32, TR=8, TC=16)
    # exercising the padded-row/column masking.
    x3 = jax.random.normal(jax.random.PRNGKey(2), (20, 32), dtype=jnp.float32)
    loss3 = koleo_loss_proportions(x3, tiles=(8, 16))
    jax.block_until_ready(loss3)
    ref3 = _reference(x3)
    assert jnp.allclose(loss3, ref3, atol=1e-4, rtol=1e-4), (loss3, ref3)

    print("KERNEL_OK")
</pallas_src>

<mosaic_0001>
module attributes {stable_mosaic.version = 11 : i64} {
  func.func @_normalize_kernel(%arg0: i32, %arg1: memref<8x32xf32, #tpu.memory_space<vmem>>, %arg2: memref<8x32xf32, #tpu.memory_space<vmem>>, %arg3: memref<8x1xf32, #tpu.memory_space<vmem>>, %arg4: memref<8x1xf32, #tpu.memory_space<vmem>>) attributes {dimension_semantics = [#tpu.dimension_semantics<parallel>], iteration_bounds = array<i64: 1>, scalar_prefetch = 0 : i64, scratch_operands = 0 : i64, tpu.core_type = #tpu.core_type<tc>, window_params = [{transform_indices = @transform_0, window_bounds = array<i64: 8, 32>}, {transform_indices = @transform_1, window_bounds = array<i64: 8, 32>}, {transform_indices = @transform_2, window_bounds = array<i64: 8, 1>}, {transform_indices = @transform_3, window_bounds = array<i64: 8, 1>}]} {
    %c0 = arith.constant 0 : index
    %c0_0 = arith.constant 0 : index
    %0 = vector.load %arg1[%c0, %c0_0] : memref<8x32xf32, #tpu.memory_space<vmem>>, vector<8x32xf32>
    %1 = arith.mulf %0, %0 : vector<8x32xf32>
    %cst = arith.constant dense<0.000000e+00> : vector<8xf32>
    %2 = vector.multi_reduction <add>, %1, %cst [1] : vector<8x32xf32> to vector<8xf32>
    %3 = vector.shape_cast %2 : vector<8xf32> to vector<8x1xf32>
    %4 = math.sqrt %3 : vector<8x1xf32>
    %cst_1 = arith.constant 9.99999993E-9 : f32
    %5 = vector.broadcast %cst_1 : f32 to vector<8x1xf32>
    %6 = arith.maximumf %4, %5 : vector<8x1xf32>
    %7 = vector.broadcast %6 : vector<8x1xf32> to vector<8x32xf32>
    %8 = arith.divf %0, %7 : vector<8x32xf32>
    %c0_2 = arith.constant 0 : index
    %c0_3 = arith.constant 0 : index
    %9 = vector.load %arg2[%c0_2, %c0_3] : memref<8x32xf32, #tpu.memory_space<vmem>>, vector<8x32xf32>
    tpu.vector_store %arg2[%c0_2, %c0_3], %8 {strides = array<i32>} : memref<8x32xf32, #tpu.memory_space<vmem>>, vector<8x32xf32>,
    %cst_4 = arith.constant dense<0.000000e+00> : vector<8xf32>
    %10 = vector.multi_reduction <add>, %0, %cst_4 [1] : vector<8x32xf32> to vector<8xf32>
    %11 = vector.shape_cast %10 : vector<8xf32> to vector<8x1xf32>
    %12 = arith.divf %11, %6 : vector<8x1xf32>
    %13 = arith.mulf %6, %6 : vector<8x1xf32>
    %14 = arith.divf %3, %13 : vector<8x1xf32>
    %cst_5 = arith.constant 2.000000e+00 : f32
    %cst_6 = arith.constant 9.99999993E-9 : f32
    %15 = arith.mulf %cst_5, %cst_6 : f32
    %16 = vector.broadcast %15 : f32 to vector<8x1xf32>
    %17 = arith.mulf %16, %12 : vector<8x1xf32>
    %18 = arith.addf %14, %17 : vector<8x1xf32>
    %c0_7 = arith.constant 0 : index
    %c0_8 = arith.constant 0 : index
    %19 = vector.load %arg3[%c0_7, %c0_8] : memref<8x1xf32, #tpu.memory_space<vmem>>, vector<8x1xf32>
    tpu.vector_store %arg3[%c0_7, %c0_8], %18 {strides = array<i32>} : memref<8x1xf32, #tpu.memory_space<vmem>>, vector<8x1xf32>,
    %cst_9 = arith.constant 2.000000e+00 : f32
    %cst_10 = arith.constant 9.99999993E-9 : f32
    %20 = arith.mulf %cst_9, %cst_10 : f32
    %21 = vector.broadcast %20 : f32 to vector<8x1xf32>
    %22 = arith.mulf %21, %12 : vector<8x1xf32>
    %23 = arith.subf %14, %22 : vector<8x1xf32>
    %c0_11 = arith.constant 0 : index
    %c0_12 = arith.constant 0 : index
    %24 = vector.load %arg4[%c0_11, %c0_12] : memref<8x1xf32, #tpu.memory_space<vmem>>, vector<8x1xf32>
    tpu.vector_store %arg4[%c0_11, %c0_12], %23 {strides = array<i32>} : memref<8x1xf32, #tpu.memory_space<vmem>>, vector<8x1xf32>,
    return
  }
  func.func @transform_0(%arg0: i32) -> (i32, i32) {
    %c0_i32 = arith.constant 0 : i32
    %c0_i32_0 = arith.constant 0 : i32
    return %arg0, %c0_i32 : i32, i32
  }
  func.func @transform_1(%arg0: i32) -> (i32, i32) {
    %c0_i32 = arith.constant 0 : i32
    %c0_i32_0 = arith.constant 0 : i32
    return %arg0, %c0_i32 : i32, i32
  }
  func.func @transform_2(%arg0: i32) -> (i32, i32) {
    %c0_i32 = arith.constant 0 : i32
    %c0_i32_0 = arith.constant 0 : i32
    return %arg0, %c0_i32 : i32, i32
  }
  func.func @transform_3(%arg0: i32) -> (i32, i32) {
    %c0_i32 = arith.constant 0 : i32
    %c0_i32_0 = arith.constant 0 : i32
    return %arg0, %c0_i32 : i32, i32
  }
}

</mosaic_0001>

<bundles_post_ra>
// kernel: tpu_custom_call.1
= control target key start
LH: loop header
LB: loop body
LE: loop exit
PB: predicated region body
PF: predicated region fallthrough
CT: control target
= control target key end

     0   :  { %9 = vsyncpa [#allocation3], 0  ;;  %s190_s0 = inlined_call_operand.hbm [shape: f32[8,32], index: 0, kind: input, shape index: {}]   ;;  %s191_s1 = inlined_call_operand.hbm [shape: f32[8,32], index: 1, kind: output, shape index: {0}]   ;;  %s192_s2 = inlined_call_operand.vmem [shape: f32[8,1], index: 2, kind: output, shape index: {1}]   ;;  %s193_s3 = inlined_call_operand.vmem [shape: f32[8,1], index: 3, kind: output, shape index: {2}]  }
   0x1   :  { %10 = vsyncpa [#allocation4], 0  ;;  %s133_s12 = smov [#allocation2]   ;;  %s85_s16 = scalar_lea.hbm %s190_s0, 128 }
   0x2   :  { %s17_s13 = sshll.u32 %s133_s12, 4  ;;  %p86_p0 = scmp.ne.s32.totalorder %s190_s0, %s85_s16  ;;  %s18_s13 = int_to_ptr.vmem [resolvable:$true] %s17_s13 }
   0x3   :  { %p89_p1 = scmp.lt.u32.totalorder %s85_s16, %s190_s0 }
   0x5   :  { %p91_p2 = pnand %p89_p1, %p86_p0 }
   0x7   :  { %94 = shalt.err (!%p91_p2)
}
   0x8   :  { %s95_s21 = scalar_lea.vmem %s18_s13, 128  ;;  %p100_p4 = scmp.lt.s32.totalorder %s18_s13, %s18_s13 }
   0x9   :  { %p96_p3 = scmp.ne.s32.totalorder %s18_s13, %s95_s21  ;;  %p101_p5 = scmp.lt.s32.totalorder %s95_s21, %s95_s21 }
   0xb   :  { %p102_p6 = por %p101_p5, %p100_p4 }
   0xd   :  { %p103_p7 = pnand %p102_p6, %p96_p3 }
   0xf   :  { %106 = shalt.err (!%p103_p7)
}
  0x10   :  { %20 = dma.hbm_to_vmem [thread:$0]  %s190_s0, 128, %s18_s13, [#allocation3]  }
  0x11   :  { %129 = dma.done.wait [#allocation3], 128  }
  0x12   :  { %130 = vsyncadd [#allocation3], 4294967168  ;;  %v24_v0 = vld [vmem:[#allocation2] sm:$0xff]  ;;  %vm26_vm0 = vcmask 261120   ;;  %s134_s0 = smov [#allocation5]   ;;  %vm50_vm3 = vcmask 7168  }
  0x13   :  { %v25_v1 = vmul.f32 %v24_v0, %v24_v0  ;;  %v41_v3 = vsel %vm26_vm0, %v24_v0, 0.0  ;;  %s60_s24 = sshll.u32 %s134_s0, 4  ;;  %s61_s24 = int_to_ptr.vmem [resolvable:$true] %s60_s24 }
  0x14   :  { %s107_s25 = scalar_lea.vmem %s61_s24, 128  ;;  %p112_p9 = scmp.lt.s32.totalorder %s61_s24, %s61_s24 }
  0x15   :  { %v27_v2 = vsel %vm26_vm0, %v25_v1, 0.0  ;;  %p108_p8 = scmp.ne.s32.totalorder %s61_s24, %s107_s25  ;;  %p113_p10 = scmp.lt.s32.totalorder %s107_s25, %s107_s25 }
  0x16   :  { %28 = vadd.xlane.f32.xlu0 %v27_v2 }
  0x17   :  { %p114_p11 = por %p113_p10, %p112_p9 }
  0x19   :  { %p115_p12 = pnand %p114_p11, %p108_p8 }
  0x1a   :  { %42 = vadd.xlane.f32.xlu0 %v41_v3 }
  0xa3   :  { %v29_v4 = vpop.xlane.xlu0 %28 }
  0xa4   :  { %79 = vrsqrt.f32 %v29_v4  ;;  %vm32_vm1 = vcmp.eq.f32.partialorder %v29_v4, inf  ;;  %v35_v7 = vand.u32 2147483648, %v29_v4  ;;  %vm34_vm2 = vcmp.eq.f32.partialorder %v29_v4, 0.0 }
  0xa7   :  { %v43_v12 = vpop.xlane.xlu0 %42 }
  0xae   :  { %v80_v5 = vpop.eup %79 }
  0xaf   :  { %v31_v6 = vmul.f32 %v80_v5, %v29_v4 }
  0xb1   :  { %v33_v8 = vsel %vm32_vm1, %v29_v4, %v31_v6 }
  0xb2   :  { %v36_v9 = vsel %vm34_vm2, %v35_v7, %v33_v8 }
  0xb3   :  { %v37_v10 = vmax.f32 %v36_v9, 1e-08 }
  0xb5   :  { %81 = vrcp.f32 %v37_v10  ;;  %v45_v11 = vmul.f32 %v37_v10, %v37_v10 }
  0xb7   :  { %83 = vrcp.f32 %v45_v11 }
  0xbf   :  { %v82_v13 = vpop.eup %81 }
  0xc0   :  { %v44_v14 = vmul.f32 %v82_v13, %v43_v12  ;;  %v39_v15 = vmul.f32 %v82_v13, %v24_v0 }
  0xc1   :  { %v84_v16 = vpop.eup %83 }
  0xc2   :  { %v47_v17 = vmul.f32 %v84_v16, %v29_v4  ;;  %v48_v18 = vmul.f32 2e-08, %v44_v14  ;;  %40 = vst.msk [vmem:[#allocation5] sm:$0xff] %vm26_vm0, %v39_v15 }
  0xc3   :  { %118 = shalt.err (!%p115_p12)
}
  0xc4   :  { %s119_s28 = scalar_lea.hbm %s191_s1, 128 }
  0xc5   :  { %p120_p13 = scmp.ne.s32.totalorder %s191_s1, %s119_s28  ;;  %p123_p0 = scmp.lt.u32.totalorder %s119_s28, %s191_s1 }
  0xc7   :  { %p125_p1 = pnand %p123_p0, %p120_p13 }
  0xc9   :  { %128 = shalt.err (!%p125_p1)
}
  0xca   :  { %63 = dma.vmem_to_hbm [thread:$0]  %s61_s24, 128, %s191_s1, [#allocation4]   ;;  %v49_v19 = vadd.f32 %v48_v18, %v47_v17  ;;  %v52_v20 = vsub.f32 %v47_v17, %v48_v18 }
  0xcc   :  { %51 = vst.msk [vmem:[%s192_s2] sm:$0xff] %vm50_vm3, %v49_v19  ;;  %53 = vst.msk [vmem:[%s193_s3] sm:$0xff] %vm50_vm3, %v52_v20 }
  0xcd   :  { %131 = dma.done.wait [#allocation4], 128  }
  0xce   :  { %132 = vsyncadd [#allocation4], 4294967168 }
  0xcf   :  { %75 = vsyncpa [#allocation3], 1 }
  0xd0   :  { %76 = vsyncpa [#allocation4], 1 }

</bundles_post_ra>
